<compile_context>
chip_gen: v6e
topology: v6e:2x2x1
jax: 0.10.0
libtpu: 0.0.40
codegen_flags: <defaults>
</compile_context>

<pallas_src>
import jax
import jax.numpy as jnp
from jax.experimental import pallas as pl
from jax.experimental.pallas import tpu as pltpu


def _round_up(x, m):
    return ((x + m - 1) // m) * m


def _vmem_capacity_bytes():
    try:
        info = pltpu.get_tpu_info()
        cap = int(getattr(info, "vmem_capacity_bytes", 0))
        if cap > 0:
            return cap
    except Exception:
        pass
    return 64 << 20  # conservative fallback: v7x per-TensorCore VMEM


# ---------------------------------------------------------------------------
# Kernels
# ---------------------------------------------------------------------------

def _resident_kernel(x_ref, w1_ref, b1_ref, w2_ref, b2_ref, o_ref):
    # grid = (batch_tiles,).  W1/W2/biases are VMEM-resident (constant index).
    # x_ref: [tm, Hp]  w1_ref: [Hp, Hp]  b1_ref: [1, Hp]
    # w2_ref:[Hp, Lp]  b2_ref: [1, Lp]   o_ref:  [tm, Lp]
    h = jnp.dot(x_ref[...], w1_ref[...], preferred_element_type=jnp.float32)
    h = jnp.tanh(h + b1_ref[...].astype(jnp.float32))      # f32 (EUP; v5e-safe)
    out = jnp.dot(h.astype(w2_ref.dtype), w2_ref[...],
                  preferred_element_type=jnp.float32)
    o_ref[...] = (out + b2_ref[...].astype(jnp.float32)).astype(o_ref.dtype)


def _streamed_kernel(x_ref, w1_ref, b1_ref, w2_ref, b2_ref, o_ref, acc_ref):
    # grid = (batch_tiles, K_tiles).  W1 streamed in K-slabs, f32 accumulator.
    # x_ref: [tm, tk]  w1_ref: [tk, Hp]  acc_ref: [tm, Hp] f32 (resident over K)
    k = pl.program_id(1)

    @pl.when(k == 0)
    def _init():
        # Fold the dense bias into the accumulator init (one broadcast / tile).
        acc_ref[...] = jnp.broadcast_to(
            b1_ref[...].astype(jnp.float32), acc_ref.shape)

    acc_ref[...] += jnp.dot(x_ref[...], w1_ref[...],
                            preferred_element_type=jnp.float32)

    @pl.when(k == pl.num_programs(1) - 1)
    def _finalize():
        h = jnp.tanh(acc_ref[...])                          # f32 (v5e-safe)
        out = jnp.dot(h.astype(w2_ref.dtype), w2_ref[...],
                      preferred_element_type=jnp.float32)
        o_ref[...] = (out + b2_ref[...].astype(jnp.float32)).astype(o_ref.dtype)


# ---------------------------------------------------------------------------
# Wrapper
# ---------------------------------------------------------------------------

def _pick_tm(B, fits):
    """Largest batch tile that fits VMEM; keep >= 2 tiles when B >= 256."""
    if B <= 128:
        return _round_up(B, 8)
    if B <= 256:
        return 128
    for tm in (512, 384, 256, 128):
        if 2 * tm > _round_up(B, 128):   # both TensorCores should get a tile
            continue
        if fits(tm):
            return tm
    return 128


def classification_head(x, w1, b1, w2, b2, *, force_streamed=False):
    """x: [B, H], w1: [H, H], b1: [H], w2: [H, L], b2: [L]  ->  [B, L].

    Weights are stored pre-transposed relative to nn.Linear (i.e. weight.T),
    so both matmuls are plain row-major x @ W.
    """
    B, H = x.shape
    L = w2.shape[1]

    Hp = _round_up(H, 128)
    Lp = _round_up(L, 128)
    isz = max(jnp.dtype(a.dtype).itemsize for a in (x, w1, w2))

    cap = _vmem_capacity_bytes()
    budget = int(0.75 * cap)      # headroom for Mosaic internal scratch

    def resident_fp(tm):
        # Conservative: count invariant operands double-buffered (valid whether
        # or not Buffered(1) is honored).
        return (2 * Hp * Hp * isz            # W1 (resident)
                + 2 * Hp * Lp * isz          # W2
                + 2 * (Hp + Lp) * isz        # biases
                + 2 * tm * Hp * isz          # x tile (double buffered)
                + 2 * tm * Lp * isz          # out tile
                + 2 * tm * Hp * 4            # f32 dense result + tanh temp
                + tm * Lp * 4)               # f32 out_proj result

    def streamed_fp(tm, tk):
        return (2 * tm * tk * isz            # x tile
                + 2 * tk * Hp * isz          # W1 K-slab
                + 2 * Hp * Lp * isz          # W2
                + 2 * (Hp + Lp) * isz        # biases
                + 2 * tm * Lp * isz          # out tile
                + 2 * tm * Hp * 4            # f32 accumulator + tanh temp
                + tm * Lp * 4)

    tm_min = _round_up(B, 8) if B <= 128 else 128
    resident = (not force_streamed) and resident_fp(tm_min) <= budget

    if resident:
        tm = _pick_tm(B, lambda t: resident_fp(t) <= budget)
        tk = Hp
        footprint = resident_fp(tm)
    else:
        # TODO(synk): for very large H (Hp >= 8192) additionally N-tile the Hp
        # columns so VMEM scales with the tile rather than with H (v7x 64 MiB).
        tk = next((c for c in (512, 256, 128)
                   if Hp % c == 0 and streamed_fp(tm_min, c) <= budget), 128)
        tm = _pick_tm(B, lambda t: streamed_fp(t, tk) <= budget)
        footprint = streamed_fp(tm, tk)

    Bp = _round_up(B, tm)

    # Pad only when needed (skips the extra H^2 HBM round trip for aligned H).
    # TODO(synk): for repeated inference, hoist weight padding out of the
    # per-call path (pad once at load time).
    if (Bp, Hp) == (B, H):
        xp = x
    else:
        xp = jnp.zeros((Bp, Hp), x.dtype).at[:B, :H].set(x)
    if Hp == H:
        w1p = w1
        b1p = b1.reshape(1, H)
    else:
        w1p = jnp.zeros((Hp, Hp), w1.dtype).at[:H, :H].set(w1)
        b1p = jnp.zeros((1, Hp), b1.dtype).at[0, :H].set(b1)
    if (Hp, Lp) == (H, L):
        w2p = w2
        b2p = b2.reshape(1, L)
    else:
        w2p = jnp.zeros((Hp, Lp), w2.dtype).at[:H, :L].set(w2)
        b2p = jnp.zeros((1, Lp), b2.dtype).at[0, :L].set(b2)

    vmem_limit = int(min(int(0.85 * cap), max(32 << 20, 2 * footprint)))

    n_batch_tiles = Bp // tm
    w1_passes = 1 if resident else n_batch_tiles
    out_isz = jnp.dtype(x.dtype).itemsize
    cost = pl.CostEstimate(
        flops=2 * Bp * Hp * Hp + 2 * Bp * Hp * Lp,
        transcendentals=Bp * Hp,
        bytes_accessed=int(xp.size * xp.dtype.itemsize
                           + w1p.size * w1p.dtype.itemsize * w1_passes
                           + b1p.size * b1p.dtype.itemsize
                           + w2p.size * w2p.dtype.itemsize
                           + b2p.size * b2p.dtype.itemsize
                           + Bp * Lp * out_isz),
    )

    def build(single_buffer_invariants):
        def inv(shape, index_map):
            # Invariant operands: no double buffer (saves VMEM, esp. on v7x).
            if single_buffer_invariants:
                return pl.BlockSpec(shape, index_map,
                                    pipeline_mode=pl.Buffered(1))
            return pl.BlockSpec(shape, index_map)

        if resident:
            grid = (n_batch_tiles,)
            in_specs = [
                pl.BlockSpec((tm, Hp), lambda i: (i, 0)),    # x tile
                inv((Hp, Hp), lambda i: (0, 0)),             # W1 (resident)
                inv((1, Hp), lambda i: (0, 0)),              # b1
                inv((Hp, Lp), lambda i: (0, 0)),             # W2
                inv((1, Lp), lambda i: (0, 0)),              # b2
            ]
            out_specs = pl.BlockSpec((tm, Lp), lambda i: (i, 0))
            scratch = []
            kernel = _resident_kernel
            dims = ("parallel",)
        else:
            grid = (n_batch_tiles, Hp // tk)
            in_specs = [
                pl.BlockSpec((tm, tk), lambda i, k: (i, k)),  # x tile
                pl.BlockSpec((tk, Hp), lambda i, k: (k, 0)),  # W1 K-slab
                inv((1, Hp), lambda i, k: (0, 0)),            # b1
                inv((Hp, Lp), lambda i, k: (0, 0)),           # W2
                inv((1, Lp), lambda i, k: (0, 0)),            # b2
            ]
            out_specs = pl.BlockSpec((tm, Lp), lambda i, k: (i, 0))
            scratch = [pltpu.VMEM((tm, Hp), jnp.float32)]
            kernel = _streamed_kernel
            dims = ("parallel", "arbitrary")

        return pl.pallas_call(
            kernel,
            out_shape=jax.ShapeDtypeStruct((Bp, Lp), x.dtype),
            grid_spec=pltpu.PrefetchScalarGridSpec(
                num_scalar_prefetch=0,
                grid=grid,
                in_specs=in_specs,
                out_specs=out_specs,
                scratch_shapes=scratch,
            ),
            compiler_params=pltpu.CompilerParams(
                dimension_semantics=dims,
                vmem_limit_bytes=vmem_limit,
            ),
            cost_estimate=cost,
        )

    try:
        out_p = build(single_buffer_invariants=True)(xp, w1p, b1p, w2p, b2p)
    except Exception:
        # Fallback for JAX versions without BlockSpec(pipeline_mode=...):
        # double-buffer the invariants (footprint estimate already covers it).
        out_p = build(single_buffer_invariants=False)(xp, w1p, b1p, w2p, b2p)

    return out_p[:B, :L]


def reference(x, w1, b1, w2, b2):
    h = jnp.tanh(x @ w1 + b1)
    return h @ w2 + b2


if __name__ == "__main__":
    key = jax.random.PRNGKey(0)

    # --- 1) Module-sized check (toy shape from the spec): f32, resident W1. ---
    B, H, L = 8, 32, 4  # batch, hidden_size, num_labels
    kx, kw1, kb1, kw2, kb2 = jax.random.split(key, 5)
    x = jax.random.normal(kx, (B, H), dtype=jnp.float32)
    w1 = jax.random.normal(kw1, (H, H), dtype=jnp.float32) * 0.1
    b1 = jax.random.normal(kb1, (H,), dtype=jnp.float32) * 0.1
    w2 = jax.random.normal(kw2, (H, L), dtype=jnp.float32) * 0.1
    b2 = jax.random.normal(kb2, (L,), dtype=jnp.float32) * 0.1

    out = classification_head(x, w1, b1, w2, b2)
    jax.block_until_ready(out)
    ref = reference(x, w1, b1, w2, b2)
    assert out.shape == (B, L)
    assert jnp.allclose(out, ref, atol=1e-4, rtol=1e-4), \
        float(jnp.max(jnp.abs(out - ref)))

    # --- 2) Multi-batch-tile check: bf16, resident-W1 path, grid=(2,). ---
    B2, H2, L2 = 256, 384, 10
    k2 = jax.random.split(jax.random.PRNGKey(1), 5)
    x2 = jax.random.normal(k2[0], (B2, H2), jnp.float32).astype(jnp.bfloat16)
    w1b = (jax.random.normal(k2[1], (H2, H2), jnp.float32) * 0.05).astype(jnp.bfloat16)
    b1b = (jax.random.normal(k2[2], (H2,), jnp.float32) * 0.05).astype(jnp.bfloat16)
    w2b = (jax.random.normal(k2[3], (H2, L2), jnp.float32) * 0.05).astype(jnp.bfloat16)
    b2b = (jax.random.normal(k2[4], (L2,), jnp.float32) * 0.05).astype(jnp.bfloat16)

    ref2 = reference(x2.astype(jnp.float32), w1b.astype(jnp.float32),
                     b1b.astype(jnp.float32), w2b.astype(jnp.float32),
                     b2b.astype(jnp.float32))

    out2 = classification_head(x2, w1b, b1b, w2b, b2b)
    jax.block_until_ready(out2)
    assert out2.shape == (B2, L2)
    assert jnp.allclose(out2.astype(jnp.float32), ref2, atol=3e-2, rtol=3e-2), \
        float(jnp.max(jnp.abs(out2.astype(jnp.float32) - ref2)))

    # --- 3) Streamed-W1 fallback path (K-tiled grid=(2,3)), same data. ---
    out3 = classification_head(x2, w1b, b1b, w2b, b2b, force_streamed=True)
    jax.block_until_ready(out3)
    assert out3.shape == (B2, L2)
    assert jnp.allclose(out3.astype(jnp.float32), ref2, atol=3e-2, rtol=3e-2), \
        float(jnp.max(jnp.abs(out3.astype(jnp.float32) - ref2)))

    print("KERNEL_OK")
</pallas_src>

<mosaic_0001>
module attributes {stable_mosaic.version = 11 : i64} {
  func.func @_resident_kernel(%arg0: i32, %arg1: memref<8x128xf32, #tpu.memory_space<vmem>>, %arg2: memref<128x128xf32, #tpu.memory_space<vmem>>, %arg3: memref<1x128xf32, #tpu.memory_space<vmem>>, %arg4: memref<128x128xf32, #tpu.memory_space<vmem>>, %arg5: memref<1x128xf32, #tpu.memory_space<vmem>>, %arg6: memref<8x128xf32, #tpu.memory_space<vmem>>) attributes {dimension_semantics = [#tpu.dimension_semantics<parallel>], iteration_bounds = array<i64: 1>, scalar_prefetch = 0 : i64, scratch_operands = 0 : i64, tpu.core_type = #tpu.core_type<tc>, window_params = [{transform_indices = @transform_0, window_bounds = array<i64: 8, 128>}, {pipeline_mode = #tpu.pipeline_mode<synchronous>, transform_indices = @transform_1, window_bounds = array<i64: 128, 128>}, {pipeline_mode = #tpu.pipeline_mode<synchronous>, transform_indices = @transform_2, window_bounds = array<i64: 1, 128>}, {pipeline_mode = #tpu.pipeline_mode<synchronous>, transform_indices = @transform_3, window_bounds = array<i64: 128, 128>}, {pipeline_mode = #tpu.pipeline_mode<synchronous>, transform_indices = @transform_4, window_bounds = array<i64: 1, 128>}, {transform_indices = @transform_5, window_bounds = array<i64: 8, 128>}]} {
    %c0 = arith.constant 0 : index
    %c0_0 = arith.constant 0 : index
    %0 = vector.load %arg1[%c0, %c0_0] : memref<8x128xf32, #tpu.memory_space<vmem>>, vector<8x128xf32>
    %c0_1 = arith.constant 0 : index
    %c0_2 = arith.constant 0 : index
    %1 = vector.load %arg2[%c0_1, %c0_2] : memref<128x128xf32, #tpu.memory_space<vmem>>, vector<128x128xf32>
    %cst = arith.constant dense<0.000000e+00> : vector<8x128xf32>
    %2 = tpu.matmul %0, %1, %cst {dimension_numbers = #tpu.dot_dimension_numbers<[1], [0], [0], [1], [0, 0, 1, 1], [], []>} : vector<8x128xf32>, vector<128x128xf32>, vector<8x128xf32> -> vector<8x128xf32>
    %c0_3 = arith.constant 0 : index
    %c0_4 = arith.constant 0 : index
    %3 = vector.load %arg3[%c0_3, %c0_4] : memref<1x128xf32, #tpu.memory_space<vmem>>, vector<1x128xf32>
    %4 = vector.broadcast %3 : vector<1x128xf32> to vector<8x128xf32>
    %5 = arith.addf %2, %4 : vector<8x128xf32>
    %6 = math.tanh %5 : vector<8x128xf32>
    %c0_5 = arith.constant 0 : index
    %c0_6 = arith.constant 0 : index
    %7 = vector.load %arg4[%c0_5, %c0_6] : memref<128x128xf32, #tpu.memory_space<vmem>>, vector<128x128xf32>
    %cst_7 = arith.constant dense<0.000000e+00> : vector<8x128xf32>
    %8 = tpu.matmul %6, %7, %cst_7 {dimension_numbers = #tpu.dot_dimension_numbers<[1], [0], [0], [1], [0, 0, 1, 1], [], []>} : vector<8x128xf32>, vector<128x128xf32>, vector<8x128xf32> -> vector<8x128xf32>
    %c0_8 = arith.constant 0 : index
    %c0_9 = arith.constant 0 : index
    %9 = vector.load %arg5[%c0_8, %c0_9] : memref<1x128xf32, #tpu.memory_space<vmem>>, vector<1x128xf32>
    %10 = vector.broadcast %9 : vector<1x128xf32> to vector<8x128xf32>
    %11 = arith.addf %8, %10 : vector<8x128xf32>
    %c0_10 = arith.constant 0 : index
    %c0_11 = arith.constant 0 : index
    %12 = vector.load %arg6[%c0_10, %c0_11] : memref<8x128xf32, #tpu.memory_space<vmem>>, vector<8x128xf32>
    tpu.vector_store %arg6[%c0_10, %c0_11], %11 {strides = array<i32>} : memref<8x128xf32, #tpu.memory_space<vmem>>, vector<8x128xf32>,
    return
  }
  func.func @transform_0(%arg0: i32) -> (i32, i32) {
    %c0_i32 = arith.constant 0 : i32
    %c0_i32_0 = arith.constant 0 : i32
    return %arg0, %c0_i32 : i32, i32
  }
  func.func @transform_1(%arg0: i32) -> (i32, i32) {
    %c0_i32 = arith.constant 0 : i32
    %c0_i32_0 = arith.constant 0 : i32
    %c0_i32_1 = arith.constant 0 : i32
    return %c0_i32, %c0_i32_0 : i32, i32
  }
  func.func @transform_2(%arg0: i32) -> (i32, i32) {
    %c0_i32 = arith.constant 0 : i32
    %c0_i32_0 = arith.constant 0 : i32
    %c0_i32_1 = arith.constant 0 : i32
    return %c0_i32, %c0_i32_0 : i32, i32
  }
  func.func @transform_3(%arg0: i32) -> (i32, i32) {
    %c0_i32 = arith.constant 0 : i32
    %c0_i32_0 = arith.constant 0 : i32
    %c0_i32_1 = arith.constant 0 : i32
    return %c0_i32, %c0_i32_0 : i32, i32
  }
  func.func @transform_4(%arg0: i32) -> (i32, i32) {
    %c0_i32 = arith.constant 0 : i32
    %c0_i32_0 = arith.constant 0 : i32
    %c0_i32_1 = arith.constant 0 : i32
    return %c0_i32, %c0_i32_0 : i32, i32
  }
  func.func @transform_5(%arg0: i32) -> (i32, i32) {
    %c0_i32 = arith.constant 0 : i32
    %c0_i32_0 = arith.constant 0 : i32
    return %arg0, %c0_i32 : i32, i32
  }
}

module attributes {stable_mosaic.version = 11 : i64} {
  func.func @_resident_kernel(%arg0: i32, %arg1: memref<8x128xf32, #tpu.memory_space<vmem>>, %arg2: memref<128x128xf32, #tpu.memory_space<vmem>>, %arg3: memref<1x128xf32, #tpu.memory_space<vmem>>, %arg4: memref<128x128xf32, #tpu.memory_space<vmem>>, %arg5: memref<1x128xf32, #tpu.memory_space<vmem>>, %arg6: memref<8x128xf32, #tpu.memory_space<vmem>>) attributes {dimension_semantics = [#tpu.dimension_semantics<parallel>], iteration_bounds = array<i64: 1>, scalar_prefetch = 0 : i64, scratch_operands = 0 : i64, tpu.core_type = #tpu.core_type<tc>, window_params = [{transform_indices = @transform_0, window_bounds = array<i64: 8, 128>}, {pipeline_mode = #tpu.pipeline_mode<synchronous>, transform_indices = @transform_1, window_bounds = array<i64: 128, 128>}, {pipeline_mode = #tpu.pipeline_mode<synchronous>, transform_indices = @transform_2, window_bounds = array<i64: 1, 128>}, {pipeline_mode = #tpu.pipeline_mode<synchronous>, transform_indices = @transform_3, window_bounds = array<i64: 128, 128>}, {pipeline_mode = #tpu.pipeline_mode<synchronous>, transform_indices = @transform_4, window_bounds = array<i64: 1, 128>}, {transform_indices = @transform_5, window_bounds = array<i64: 8, 128>}]} {
    %c0 = arith.constant 0 : index
    %c0_0 = arith.constant 0 : index
    %0 = vector.load %arg1[%c0, %c0_0] : memref<8x128xf32, #tpu.memory_space<vmem>>, vector<8x128xf32>
    %c0_1 = arith.constant 0 : index
    %c0_2 = arith.constant 0 : index
    %1 = vector.load %arg2[%c0_1, %c0_2] : memref<128x128xf32, #tpu.memory_space<vmem>>, vector<128x128xf32>
    %cst = arith.constant dense<0.000000e+00> : vector<8x128xf32>
    %2 = tpu.matmul %0, %1, %cst {dimension_numbers = #tpu.dot_dimension_numbers<[1], [0], [0], [1], [0, 0, 1, 1], [], []>} : vector<8x128xf32>, vector<128x128xf32>, vector<8x128xf32> -> vector<8x128xf32>
    %c0_3 = arith.constant 0 : index
    %c0_4 = arith.constant 0 : index
    %3 = vector.load %arg3[%c0_3, %c0_4] : memref<1x128xf32, #tpu.memory_space<vmem>>, vector<1x128xf32>
    %4 = vector.broadcast %3 : vector<1x128xf32> to vector<8x128xf32>
    %5 = arith.addf %2, %4 : vector<8x128xf32>
    %6 = math.tanh %5 : vector<8x128xf32>
    %c0_5 = arith.constant 0 : index
    %c0_6 = arith.constant 0 : index
    %7 = vector.load %arg4[%c0_5, %c0_6] : memref<128x128xf32, #tpu.memory_space<vmem>>, vector<128x128xf32>
    %cst_7 = arith.constant dense<0.000000e+00> : vector<8x128xf32>
    %8 = tpu.matmul %6, %7, %cst_7 {dimension_numbers = #tpu.dot_dimension_numbers<[1], [0], [0], [1], [0, 0, 1, 1], [], []>} : vector<8x128xf32>, vector<128x128xf32>, vector<8x128xf32> -> vector<8x128xf32>
    %c0_8 = arith.constant 0 : index
    %c0_9 = arith.constant 0 : index
    %9 = vector.load %arg5[%c0_8, %c0_9] : memref<1x128xf32, #tpu.memory_space<vmem>>, vector<1x128xf32>
    %10 = vector.broadcast %9 : vector<1x128xf32> to vector<8x128xf32>
    %11 = arith.addf %8, %10 : vector<8x128xf32>
    %c0_10 = arith.constant 0 : index
    %c0_11 = arith.constant 0 : index
    %12 = vector.load %arg6[%c0_10, %c0_11] : memref<8x128xf32, #tpu.memory_space<vmem>>, vector<8x128xf32>
    tpu.vector_store %arg6[%c0_10, %c0_11], %11 {strides = array<i32>} : memref<8x128xf32, #tpu.memory_space<vmem>>, vector<8x128xf32>,
    return
  }
  func.func @transform_0(%arg0: i32) -> (i32, i32) {
    %c0_i32 = arith.constant 0 : i32
    %c0_i32_0 = arith.constant 0 : i32
    return %arg0, %c0_i32 : i32, i32
  }
  func.func @transform_1(%arg0: i32) -> (i32, i32) {
    %c0_i32 = arith.constant 0 : i32
    %c0_i32_0 = arith.constant 0 : i32
    %c0_i32_1 = arith.constant 0 : i32
    return %c0_i32, %c0_i32_0 : i32, i32
  }
  func.func @transform_2(%arg0: i32) -> (i32, i32) {
    %c0_i32 = arith.constant 0 : i32
    %c0_i32_0 = arith.constant 0 : i32
    %c0_i32_1 = arith.constant 0 : i32
    return %c0_i32, %c0_i32_0 : i32, i32
  }
  func.func @transform_3(%arg0: i32) -> (i32, i32) {
    %c0_i32 = arith.constant 0 : i32
    %c0_i32_0 = arith.constant 0 : i32
    %c0_i32_1 = arith.constant 0 : i32
    return %c0_i32, %c0_i32_0 : i32, i32
  }
  func.func @transform_4(%arg0: i32) -> (i32, i32) {
    %c0_i32 = arith.constant 0 : i32
    %c0_i32_0 = arith.constant 0 : i32
    %c0_i32_1 = arith.constant 0 : i32
    return %c0_i32, %c0_i32_0 : i32, i32
  }
  func.func @transform_5(%arg0: i32) -> (i32, i32) {
    %c0_i32 = arith.constant 0 : i32
    %c0_i32_0 = arith.constant 0 : i32
    return %arg0, %c0_i32 : i32, i32
  }
}

</mosaic_0001>

<bundles_post_ra>
// kernel: tpu_custom_call.1
= control target key start
LH: loop header
LB: loop body
LE: loop exit
PB: predicated region body
PF: predicated region fallthrough
CT: control target
= control target key end

     0   :  { %10 = vsyncpa [#allocation3], 0  ;;  %s557_s0 = inlined_call_operand.hbm [shape: f32[8,128], index: 0, kind: input, shape index: {}]   ;;  %s558_s1 = inlined_call_operand.hbm [shape: f32[128,128], index: 1, kind: input, shape index: {}]   ;;  %s559_s2 = inlined_call_operand.vmem [shape: f32[1,128], index: 2, kind: input, shape index: {}]   ;;  %s560_s3 = inlined_call_operand.hbm [shape: f32[128,128], index: 3, kind: input, shape index: {}]   ;;  %s561_s4 = inlined_call_operand.vmem [shape: f32[1,128], index: 4, kind: input, shape index: {}]   ;;  %s562_s5 = inlined_call_operand.hbm [shape: f32[8,128], index: 5, kind: output, shape index: {}]  }
   0x1   :  { %11 = vsyncpa [#allocation6], 0 }
   0x2   :  { %12 = vsyncpa [#allocation4], 0  ;;  %s467_s18 = smov [#allocation5]  }
   0x3   :  { %s28_s19 = sshll.u32 %s467_s18, 4  ;;  %s29_s19 = int_to_ptr.vmem [resolvable:$true] %s28_s19 }
   0x4   :  { %s389_s20 = scalar_lea.vmem %s29_s19, 2048  ;;  %p394_p1 = scmp.lt.s32.totalorder %s29_s19, %s29_s19 }
   0x5   :  { %p390_p0 = scmp.ne.s32.totalorder %s29_s19, %s389_s20  ;;  %p395_p2 = scmp.lt.s32.totalorder %s389_s20, %s389_s20 }
   0x7   :  { %p396_p3 = por %p395_p2, %p394_p1 }
   0x9   :  { %p397_p4 = pnand %p396_p3, %p390_p0 }
   0xb   :  { %400 = shalt.err (!%p397_p4)
}
   0xc   :  { %s468_s21 = smov 128   ;;  %s469_s22 = smov 8  }
   0xd   :  { %34 = dma.hbm_to_vmem [thread:$0]  %s558_s1, 2048, %s29_s19, [#allocation6], %s468_s21, %s468_s21, %s469_s22  }
   0xe   :  { %s470_s25 = smov [#allocation2]   ;;  %s471_s27 = smov [#allocation7]  }
   0xf   :  { %s19_s26 = sshll.u32 %s470_s25, 4  ;;  %s42_s28 = sshll.u32 %s471_s27, 4  ;;  %s20_s26 = int_to_ptr.vmem [resolvable:$true] %s19_s26  ;;  %s43_s28 = int_to_ptr.vmem [resolvable:$true] %s42_s28 }
  0x10   :  { %s409_s29 = scalar_lea.vmem %s20_s26, 128  ;;  %p414_p6 = scmp.lt.s32.totalorder %s20_s26, %s20_s26 }
  0x11   :  { %p410_p5 = scmp.ne.s32.totalorder %s20_s26, %s409_s29  ;;  %p415_p7 = scmp.lt.s32.totalorder %s409_s29, %s409_s29 }
  0x13   :  { %p416_p8 = por %p415_p7, %p414_p6 }
  0x15   :  { %p417_p9 = pnand %p416_p8, %p410_p5 }
  0x17   :  { %420 = shalt.err (!%p417_p9)
}
  0x18   :  { %22 = dma.hbm_to_vmem [thread:$0]  %s557_s0, 128, %s20_s26, [#allocation3]  }
  0x19   :  { %s429_s7 = scalar_lea.vmem %s43_s28, 2048  ;;  %p434_p11 = scmp.lt.s32.totalorder %s43_s28, %s43_s28 }
  0x1a   :  { %p430_p10 = scmp.ne.s32.totalorder %s43_s28, %s429_s7  ;;  %p435_p12 = scmp.lt.s32.totalorder %s429_s7, %s429_s7 }
  0x1c   :  { %p436_p13 = por %p435_p12, %p434_p11 }
  0x1e   :  { %p437_p0 = pnand %p436_p13, %p430_p10 }
  0x20   :  { %440 = shalt.err (!%p437_p0)
}
  0x21   :  { %48 = dma.hbm_to_vmem [thread:$0]  %s560_s3, 2048, %s43_s28, [#allocation6], %s468_s21, %s468_s21, %s469_s22  }
  0x22   :  { %461 = dma.done.wait [#allocation3], 128  }
  0x23   :  { %462 = vsyncadd [#allocation3], 4294967168 }
  0x24   :  { %463 = dma.done.wait [#allocation6], 4096  }
  0x25   :  { %464 = vsyncadd [#allocation6], 4294963200  ;;  %v472_v0 = vmov 0.0   ;;  %vm473_vm0 = vmmov 0   ;;  %v76_v1 = vld [vmem:[#allocation5 + $0x78] sm:$0xff]  ;;  %v75_v2 = vld [vmem:[#allocation5 + $0x70] sm:$0xff] }
  0x26   :  { %301 = vmatprep.subr.mxu0 %v472_v0  ;;  %333 = vmatprep.mubr.msk.f32.mxu0 %vm473_vm0, %v472_v0  ;;  %v74_v3 = vld [vmem:[#allocation5 + $0x68] sm:$0xff]  ;;  %v73_v4 = vld [vmem:[#allocation5 + $0x60] sm:$0xff]  ;;  %v170_v5 = vld [vmem:[#allocation7 + $0x78] sm:$0xff]  ;;  %s474_s11 = smov [#allocation8]  }
  0x27   :  { %336 = vmatprep.subr.mxu1 %v472_v0  ;;  %368 = vmatprep.mubr.msk.f32.mxu1 %vm473_vm0, %v472_v0  ;;  %v72_v6 = vld [vmem:[#allocation5 + $0x58] sm:$0xff]  ;;  %v169_v7 = vld [vmem:[#allocation7 + $0x70] sm:$0xff]  ;;  %v168_v8 = vld [vmem:[#allocation7 + $0x68] sm:$0xff]  ;;  %s255_s12 = sshll.u32 %s474_s11, 4  ;;  %s256_s12 = int_to_ptr.vmem [resolvable:$true] %s255_s12 }
  0x28   :  { %302 = vmatpush3.msra.mxu0 %v76_v1  ;;  %337 = vmatpush3.msra.mxu1 %v170_v5  ;;  %v71_v9 = vld [vmem:[#allocation5 + $0x50] sm:$0xff]  ;;  %v167_v10 = vld [vmem:[#allocation7 + $0x60] sm:$0xff]  ;;  %v70_v11 = vld [vmem:[#allocation5 + $0x48] sm:$0xff]  ;;  %s441_s13 = scalar_lea.vmem %s256_s12, 128  ;;  %p446_p2 = scmp.lt.s32.totalorder %s256_s12, %s256_s12 }
  0x29   :  { %303 = vmatprep.subr.mxu0 %v472_v0  ;;  %338 = vmatprep.subr.mxu1 %v472_v0  ;;  %v166_v12 = vld [vmem:[#allocation7 + $0x58] sm:$0xff]  ;;  %v69_v13 = vld [vmem:[#allocation5 + $0x40] sm:$0xff]  ;;  %v165_v14 = vld [vmem:[#allocation7 + $0x50] sm:$0xff]  ;;  %p442_p1 = scmp.ne.s32.totalorder %s256_s12, %s441_s13  ;;  %p447_p3 = scmp.lt.s32.totalorder %s441_s13, %s441_s13 }
  0x2a   :  { %304 = vmatpush3.msra.mxu0 %v75_v2  ;;  %339 = vmatpush3.msra.mxu1 %v169_v7  ;;  %v68_v15 = vld [vmem:[#allocation5 + $0x38] sm:$0xff]  ;;  %v164_v16 = vld [vmem:[#allocation7 + $0x48] sm:$0xff]  ;;  %v67_v17 = vld [vmem:[#allocation5 + $0x30] sm:$0xff] }
  0x2b   :  { %305 = vmatprep.subr.mxu0 %v472_v0  ;;  %340 = vmatprep.subr.mxu1 %v472_v0  ;;  %v66_v18 = vld [vmem:[#allocation5 + $0x28] sm:$0xff]  ;;  %v65_v19 = vld [vmem:[#allocation5 + $0x20] sm:$0xff]  ;;  %v64_v20 = vld [vmem:[#allocation5 + $0x18] sm:$0xff]  ;;  %p448_p4 = por %p447_p3, %p446_p2 }
  0x2c   :  { %306 = vmatpush3.msra.mxu0 %v74_v3  ;;  %341 = vmatpush3.msra.mxu1 %v168_v8  ;;  %v63_v21 = vld [vmem:[#allocation5 + $0x10] sm:$0xff]  ;;  %v62_v22 = vld [vmem:[#allocation5 + $0x8] sm:$0xff]  ;;  %v61_v23 = vld [vmem:[#allocation5] sm:$0xff] }
  0x2d   :  { %307 = vmatprep.subr.mxu0 %v472_v0  ;;  %342 = vmatprep.subr.mxu1 %v472_v0  ;;  %v60_v24 = vld [vmem:[#allocation2] sm:$0xff]  ;;  %v163_v25 = vld [vmem:[#allocation7 + $0x40] sm:$0xff]  ;;  %v161_v27 = vld [vmem:[#allocation7 + $0x30] sm:$0xff]  ;;  %p449_p5 = pnand %p448_p4, %p442_p1 }
  0x2e   :  { %308 = vmatpush3.msra.mxu0 %v73_v4  ;;  %343 = vmatpush3.msra.mxu1 %v167_v10  ;;  %v162_v26 = vld [vmem:[#allocation7 + $0x38] sm:$0xff]  ;;  %v160_v28 = vld [vmem:[#allocation7 + $0x28] sm:$0xff]  ;;  %v159_v29 = vld [vmem:[#allocation7 + $0x20] sm:$0xff] }
  0x2f   :  { %309 = vmatprep.subr.mxu0 %v472_v0  ;;  %344 = vmatprep.subr.mxu1 %v472_v0  ;;  %v158_v30 = vld [vmem:[#allocation7 + $0x18] sm:$0xff]  ;;  %v157_v31 = vld [vmem:[#allocation7 + $0x10] sm:$0xff]  ;;  %v156_v32 = vld [vmem:[#allocation7 + $0x8] sm:$0xff] }
  0x30   :  { %310 = vmatpush3.msra.mxu0 %v72_v6  ;;  %345 = vmatpush3.msra.mxu1 %v166_v12  ;;  %v155_v33 = vld [vmem:[#allocation7] sm:$0xff]  ;;  %v265_v34 = vld [vmem:[%s559_s2] ss:$0 sm:$0xff] }
  0x31   :  { %311 = vmatprep.subr.mxu0 %v472_v0  ;;  %346 = vmatprep.subr.mxu1 %v472_v0  ;;  %v266_v39 = vld [vmem:[%s561_s4] ss:$0 sm:$0xff] }
  0x32   :  { %312 = vmatpush3.msra.mxu0 %v71_v9  ;;  %347 = vmatpush3.msra.mxu1 %v165_v14 }
  0x33   :  { %313 = vmatprep.subr.mxu0 %v472_v0  ;;  %348 = vmatprep.subr.mxu1 %v472_v0 }
  0x34   :  { %314 = vmatpush3.msra.mxu0 %v70_v11  ;;  %349 = vmatpush3.msra.mxu1 %v164_v16 }
  0x35   :  { %315 = vmatprep.subr.mxu0 %v472_v0  ;;  %350 = vmatprep.subr.mxu1 %v472_v0 }
  0x36   :  { %316 = vmatpush3.msra.mxu0 %v69_v13  ;;  %351 = vmatpush3.msra.mxu1 %v163_v25 }
  0x37   :  { %317 = vmatprep.subr.mxu0 %v472_v0  ;;  %352 = vmatprep.subr.mxu1 %v472_v0 }
  0x38   :  { %318 = vmatpush3.msra.mxu0 %v68_v15  ;;  %353 = vmatpush3.msra.mxu1 %v162_v26 }
  0x39   :  { %319 = vmatprep.subr.mxu0 %v472_v0  ;;  %354 = vmatprep.subr.mxu1 %v472_v0 }
  0x3a   :  { %320 = vmatpush3.msra.mxu0 %v67_v17  ;;  %355 = vmatpush3.msra.mxu1 %v161_v27 }
  0x3b   :  { %321 = vmatprep.subr.mxu0 %v472_v0  ;;  %356 = vmatprep.subr.mxu1 %v472_v0 }
  0x3c   :  { %322 = vmatpush3.msra.mxu0 %v66_v18  ;;  %357 = vmatpush3.msra.mxu1 %v160_v28 }
  0x3d   :  { %323 = vmatprep.subr.mxu0 %v472_v0  ;;  %358 = vmatprep.subr.mxu1 %v472_v0 }
  0x3e   :  { %324 = vmatpush3.msra.mxu0 %v65_v19  ;;  %359 = vmatpush3.msra.mxu1 %v159_v29 }
  0x3f   :  { %325 = vmatprep.subr.mxu0 %v472_v0  ;;  %360 = vmatprep.subr.mxu1 %v472_v0 }
  0x40   :  { %326 = vmatpush3.msra.mxu0 %v64_v20  ;;  %361 = vmatpush3.msra.mxu1 %v158_v30 }
  0x41   :  { %327 = vmatprep.subr.mxu0 %v472_v0  ;;  %362 = vmatprep.subr.mxu1 %v472_v0 }
  0x42   :  { %328 = vmatpush3.msra.mxu0 %v63_v21  ;;  %363 = vmatpush3.msra.mxu1 %v157_v31 }
  0x43   :  { %329 = vmatprep.subr.mxu0 %v472_v0  ;;  %364 = vmatprep.subr.mxu1 %v472_v0 }
  0x44   :  { %330 = vmatpush3.msra.mxu0 %v62_v22  ;;  %365 = vmatpush3.msra.mxu1 %v156_v32 }
  0x45   :  { %331 = vmatprep.subr.mxu0 %v472_v0  ;;  %366 = vmatprep.subr.mxu1 %v472_v0 }
  0x46   :  { %332 = vmatpush3.msra.mxu0 %v61_v23  ;;  %367 = vmatpush3.msra.mxu1 %v155_v33 }
  0x47   :  { %334 = vmatmul.mubr.f32.vlgmr.msra.gmra.mxu0 %v60_v24 }
 0x107   :  { %v150_v35 = vpop.f32.mrf.mxu0 }
 0x108   :  { %v151_v36 = vadd.f32 %v265_v34, %v150_v35 }
 0x109   :  { %v335_v37 = vpop.f32.mrf.mxu0 }
 0x10a   :  { %379 = vtanh.f32 %v151_v36 }
 0x117   :  { %v380_v38 = vpop.eup %379 }
 0x118   :  { %369 = vmatmul.mubr.f32.vlgmr.msra.gmra.mxu1 %v380_v38 }
 0x1d8   :  { %v244_v40 = vpop.f32.mrf.mxu1 }
 0x1d9   :  { %v245_v41 = vadd.f32 %v266_v39, %v244_v40 }
 0x1da   :  { %v370_v42 = vpop.f32.mrf.mxu1 }
 0x1db   :  { %248 = vst [vmem:[#allocation8] sm:$0xff] %v245_v41 }
 0x1dc   :  { %452 = shalt.err (!%p449_p5)
}
 0x1dd   :  { %258 = dma.vmem_to_hbm [thread:$0]  %s256_s12, 128, %s562_s5, [#allocation4]  }
 0x1de   :  { %465 = dma.done.wait [#allocation4], 128  }
 0x1df   :  { %466 = vsyncadd [#allocation4], 4294967168 }
 0x1e0   :  { %262 = vsyncpa [#allocation3], 1 }
 0x1e1   :  { %263 = vsyncpa [#allocation6], 1 }
 0x1e2   :  { %264 = vsyncpa [#allocation4], 1 }

// kernel: tpu_custom_call.1
= control target key start
LH: loop header
LB: loop body
LE: loop exit
PB: predicated region body
PF: predicated region fallthrough
CT: control target
= control target key end

     0   :  { %10 = vsyncpa [#allocation3], 0  ;;  %s557_s0 = inlined_call_operand.hbm [shape: f32[8,128], index: 0, kind: input, shape index: {}]   ;;  %s558_s1 = inlined_call_operand.hbm [shape: f32[128,128], index: 1, kind: input, shape index: {}]   ;;  %s559_s2 = inlined_call_operand.vmem [shape: f32[1,128], index: 2, kind: input, shape index: {}]   ;;  %s560_s3 = inlined_call_operand.hbm [shape: f32[128,128], index: 3, kind: input, shape index: {}]   ;;  %s561_s4 = inlined_call_operand.vmem [shape: f32[1,128], index: 4, kind: input, shape index: {}]   ;;  %s562_s5 = inlined_call_operand.hbm [shape: f32[8,128], index: 5, kind: output, shape index: {}]  }
   0x1   :  { %11 = vsyncpa [#allocation6], 0 }
   0x2   :  { %12 = vsyncpa [#allocation4], 0  ;;  %s467_s18 = smov [#allocation5]  }
   0x3   :  { %s28_s19 = sshll.u32 %s467_s18, 4  ;;  %s29_s19 = int_to_ptr.vmem [resolvable:$true] %s28_s19 }
   0x4   :  { %s389_s20 = scalar_lea.vmem %s29_s19, 2048  ;;  %p394_p1 = scmp.lt.s32.totalorder %s29_s19, %s29_s19 }
   0x5   :  { %p390_p0 = scmp.ne.s32.totalorder %s29_s19, %s389_s20  ;;  %p395_p2 = scmp.lt.s32.totalorder %s389_s20, %s389_s20 }
   0x7   :  { %p396_p3 = por %p395_p2, %p394_p1 }
   0x9   :  { %p397_p4 = pnand %p396_p3, %p390_p0 }
   0xb   :  { %400 = shalt.err (!%p397_p4)
}
   0xc   :  { %s468_s21 = smov 128   ;;  %s469_s22 = smov 8  }
   0xd   :  { %34 = dma.hbm_to_vmem [thread:$0]  %s558_s1, 2048, %s29_s19, [#allocation6], %s468_s21, %s468_s21, %s469_s22  }
   0xe   :  { %s470_s25 = smov [#allocation2]   ;;  %s471_s27 = smov [#allocation7]  }
   0xf   :  { %s19_s26 = sshll.u32 %s470_s25, 4  ;;  %s42_s28 = sshll.u32 %s471_s27, 4  ;;  %s20_s26 = int_to_ptr.vmem [resolvable:$true] %s19_s26  ;;  %s43_s28 = int_to_ptr.vmem [resolvable:$true] %s42_s28 }
  0x10   :  { %s409_s29 = scalar_lea.vmem %s20_s26, 128  ;;  %p414_p6 = scmp.lt.s32.totalorder %s20_s26, %s20_s26 }
  0x11   :  { %p410_p5 = scmp.ne.s32.totalorder %s20_s26, %s409_s29  ;;  %p415_p7 = scmp.lt.s32.totalorder %s409_s29, %s409_s29 }
  0x13   :  { %p416_p8 = por %p415_p7, %p414_p6 }
  0x15   :  { %p417_p9 = pnand %p416_p8, %p410_p5 }
  0x17   :  { %420 = shalt.err (!%p417_p9)
}
  0x18   :  { %22 = dma.hbm_to_vmem [thread:$0]  %s557_s0, 128, %s20_s26, [#allocation3]  }
  0x19   :  { %s429_s7 = scalar_lea.vmem %s43_s28, 2048  ;;  %p434_p11 = scmp.lt.s32.totalorder %s43_s28, %s43_s28 }
  0x1a   :  { %p430_p10 = scmp.ne.s32.totalorder %s43_s28, %s429_s7  ;;  %p435_p12 = scmp.lt.s32.totalorder %s429_s7, %s429_s7 }
  0x1c   :  { %p436_p13 = por %p435_p12, %p434_p11 }
  0x1e   :  { %p437_p0 = pnand %p436_p13, %p430_p10 }
  0x20   :  { %440 = shalt.err (!%p437_p0)
}
  0x21   :  { %48 = dma.hbm_to_vmem [thread:$0]  %s560_s3, 2048, %s43_s28, [#allocation6], %s468_s21, %s468_s21, %s469_s22  }
  0x22   :  { %461 = dma.done.wait [#allocation3], 128  }
  0x23   :  { %462 = vsyncadd [#allocation3], 4294967168 }
  0x24   :  { %463 = dma.done.wait [#allocation6], 4096  }
  0x25   :  { %464 = vsyncadd [#allocation6], 4294963200  ;;  %v472_v0 = vmov 0.0   ;;  %vm473_vm0 = vmmov 0   ;;  %v76_v1 = vld [vmem:[#allocation5 + $0x78] sm:$0xff]  ;;  %v75_v2 = vld [vmem:[#allocation5 + $0x70] sm:$0xff] }
  0x26   :  { %301 = vmatprep.subr.mxu0 %v472_v0  ;;  %333 = vmatprep.mubr.msk.f32.mxu0 %vm473_vm0, %v472_v0  ;;  %v74_v3 = vld [vmem:[#allocation5 + $0x68] sm:$0xff]  ;;  %v73_v4 = vld [vmem:[#allocation5 + $0x60] sm:$0xff]  ;;  %v170_v5 = vld [vmem:[#allocation7 + $0x78] sm:$0xff]  ;;  %s474_s11 = smov [#allocation8]  }
  0x27   :  { %336 = vmatprep.subr.mxu1 %v472_v0  ;;  %368 = vmatprep.mubr.msk.f32.mxu1 %vm473_vm0, %v472_v0  ;;  %v72_v6 = vld [vmem:[#allocation5 + $0x58] sm:$0xff]  ;;  %v169_v7 = vld [vmem:[#allocation7 + $0x70] sm:$0xff]  ;;  %v168_v8 = vld [vmem:[#allocation7 + $0x68] sm:$0xff]  ;;  %s255_s12 = sshll.u32 %s474_s11, 4  ;;  %s256_s12 = int_to_ptr.vmem [resolvable:$true] %s255_s12 }
  0x28   :  { %302 = vmatpush3.msra.mxu0 %v76_v1  ;;  %337 = vmatpush3.msra.mxu1 %v170_v5  ;;  %v71_v9 = vld [vmem:[#allocation5 + $0x50] sm:$0xff]  ;;  %v167_v10 = vld [vmem:[#allocation7 + $0x60] sm:$0xff]  ;;  %v70_v11 = vld [vmem:[#allocation5 + $0x48] sm:$0xff]  ;;  %s441_s13 = scalar_lea.vmem %s256_s12, 128  ;;  %p446_p2 = scmp.lt.s32.totalorder %s256_s12, %s256_s12 }
  0x29   :  { %303 = vmatprep.subr.mxu0 %v472_v0  ;;  %338 = vmatprep.subr.mxu1 %v472_v0  ;;  %v166_v12 = vld [vmem:[#allocation7 + $0x58] sm:$0xff]  ;;  %v69_v13 = vld [vmem:[#allocation5 + $0x40] sm:$0xff]  ;;  %v165_v14 = vld [vmem:[#allocation7 + $0x50] sm:$0xff]  ;;  %p442_p1 = scmp.ne.s32.totalorder %s256_s12, %s441_s13  ;;  %p447_p3 = scmp.lt.s32.totalorder %s441_s13, %s441_s13 }
  0x2a   :  { %304 = vmatpush3.msra.mxu0 %v75_v2  ;;  %339 = vmatpush3.msra.mxu1 %v169_v7  ;;  %v68_v15 = vld [vmem:[#allocation5 + $0x38] sm:$0xff]  ;;  %v164_v16 = vld [vmem:[#allocation7 + $0x48] sm:$0xff]  ;;  %v67_v17 = vld [vmem:[#allocation5 + $0x30] sm:$0xff] }
  0x2b   :  { %305 = vmatprep.subr.mxu0 %v472_v0  ;;  %340 = vmatprep.subr.mxu1 %v472_v0  ;;  %v66_v18 = vld [vmem:[#allocation5 + $0x28] sm:$0xff]  ;;  %v65_v19 = vld [vmem:[#allocation5 + $0x20] sm:$0xff]  ;;  %v64_v20 = vld [vmem:[#allocation5 + $0x18] sm:$0xff]  ;;  %p448_p4 = por %p447_p3, %p446_p2 }
  0x2c   :  { %306 = vmatpush3.msra.mxu0 %v74_v3  ;;  %341 = vmatpush3.msra.mxu1 %v168_v8  ;;  %v63_v21 = vld [vmem:[#allocation5 + $0x10] sm:$0xff]  ;;  %v62_v22 = vld [vmem:[#allocation5 + $0x8] sm:$0xff]  ;;  %v61_v23 = vld [vmem:[#allocation5] sm:$0xff] }
  0x2d   :  { %307 = vmatprep.subr.mxu0 %v472_v0  ;;  %342 = vmatprep.subr.mxu1 %v472_v0  ;;  %v60_v24 = vld [vmem:[#allocation2] sm:$0xff]  ;;  %v163_v25 = vld [vmem:[#allocation7 + $0x40] sm:$0xff]  ;;  %v161_v27 = vld [vmem:[#allocation7 + $0x30] sm:$0xff]  ;;  %p449_p5 = pnand %p448_p4, %p442_p1 }
  0x2e   :  { %308 = vmatpush3.msra.mxu0 %v73_v4  ;;  %343 = vmatpush3.msra.mxu1 %v167_v10  ;;  %v162_v26 = vld [vmem:[#allocation7 + $0x38] sm:$0xff]  ;;  %v160_v28 = vld [vmem:[#allocation7 + $0x28] sm:$0xff]  ;;  %v159_v29 = vld [vmem:[#allocation7 + $0x20] sm:$0xff] }
  0x2f   :  { %309 = vmatprep.subr.mxu0 %v472_v0  ;;  %344 = vmatprep.subr.mxu1 %v472_v0  ;;  %v158_v30 = vld [vmem:[#allocation7 + $0x18] sm:$0xff]  ;;  %v157_v31 = vld [vmem:[#allocation7 + $0x10] sm:$0xff]  ;;  %v156_v32 = vld [vmem:[#allocation7 + $0x8] sm:$0xff] }
  0x30   :  { %310 = vmatpush3.msra.mxu0 %v72_v6  ;;  %345 = vmatpush3.msra.mxu1 %v166_v12  ;;  %v155_v33 = vld [vmem:[#allocation7] sm:$0xff]  ;;  %v265_v34 = vld [vmem:[%s559_s2] ss:$0 sm:$0xff] }
  0x31   :  { %311 = vmatprep.subr.mxu0 %v472_v0  ;;  %346 = vmatprep.subr.mxu1 %v472_v0  ;;  %v266_v39 = vld [vmem:[%s561_s4] ss:$0 sm:$0xff] }
  0x32   :  { %312 = vmatpush3.msra.mxu0 %v71_v9  ;;  %347 = vmatpush3.msra.mxu1 %v165_v14 }
  0x33   :  { %313 = vmatprep.subr.mxu0 %v472_v0  ;;  %348 = vmatprep.subr.mxu1 %v472_v0 }
  0x34   :  { %314 = vmatpush3.msra.mxu0 %v70_v11  ;;  %349 = vmatpush3.msra.mxu1 %v164_v16 }
  0x35   :  { %315 = vmatprep.subr.mxu0 %v472_v0  ;;  %350 = vmatprep.subr.mxu1 %v472_v0 }
  0x36   :  { %316 = vmatpush3.msra.mxu0 %v69_v13  ;;  %351 = vmatpush3.msra.mxu1 %v163_v25 }
  0x37   :  { %317 = vmatprep.subr.mxu0 %v472_v0  ;;  %352 = vmatprep.subr.mxu1 %v472_v0 }
  0x38   :  { %318 = vmatpush3.msra.mxu0 %v68_v15  ;;  %353 = vmatpush3.msra.mxu1 %v162_v26 }
  0x39   :  { %319 = vmatprep.subr.mxu0 %v472_v0  ;;  %354 = vmatprep.subr.mxu1 %v472_v0 }
  0x3a   :  { %320 = vmatpush3.msra.mxu0 %v67_v17  ;;  %355 = vmatpush3.msra.mxu1 %v161_v27 }
  0x3b   :  { %321 = vmatprep.subr.mxu0 %v472_v0  ;;  %356 = vmatprep.subr.mxu1 %v472_v0 }
  0x3c   :  { %322 = vmatpush3.msra.mxu0 %v66_v18  ;;  %357 = vmatpush3.msra.mxu1 %v160_v28 }
  0x3d   :  { %323 = vmatprep.subr.mxu0 %v472_v0  ;;  %358 = vmatprep.subr.mxu1 %v472_v0 }
  0x3e   :  { %324 = vmatpush3.msra.mxu0 %v65_v19  ;;  %359 = vmatpush3.msra.mxu1 %v159_v29 }
  0x3f   :  { %325 = vmatprep.subr.mxu0 %v472_v0  ;;  %360 = vmatprep.subr.mxu1 %v472_v0 }
  0x40   :  { %326 = vmatpush3.msra.mxu0 %v64_v20  ;;  %361 = vmatpush3.msra.mxu1 %v158_v30 }
  0x41   :  { %327 = vmatprep.subr.mxu0 %v472_v0  ;;  %362 = vmatprep.subr.mxu1 %v472_v0 }
  0x42   :  { %328 = vmatpush3.msra.mxu0 %v63_v21  ;;  %363 = vmatpush3.msra.mxu1 %v157_v31 }
  0x43   :  { %329 = vmatprep.subr.mxu0 %v472_v0  ;;  %364 = vmatprep.subr.mxu1 %v472_v0 }
  0x44   :  { %330 = vmatpush3.msra.mxu0 %v62_v22  ;;  %365 = vmatpush3.msra.mxu1 %v156_v32 }
  0x45   :  { %331 = vmatprep.subr.mxu0 %v472_v0  ;;  %366 = vmatprep.subr.mxu1 %v472_v0 }
  0x46   :  { %332 = vmatpush3.msra.mxu0 %v61_v23  ;;  %367 = vmatpush3.msra.mxu1 %v155_v33 }
  0x47   :  { %334 = vmatmul.mubr.f32.vlgmr.msra.gmra.mxu0 %v60_v24 }
 0x107   :  { %v150_v35 = vpop.f32.mrf.mxu0 }
 0x108   :  { %v151_v36 = vadd.f32 %v265_v34, %v150_v35 }
 0x109   :  { %v335_v37 = vpop.f32.mrf.mxu0 }
 0x10a   :  { %379 = vtanh.f32 %v151_v36 }
 0x117   :  { %v380_v38 = vpop.eup %379 }
 0x118   :  { %369 = vmatmul.mubr.f32.vlgmr.msra.gmra.mxu1 %v380_v38 }
 0x1d8   :  { %v244_v40 = vpop.f32.mrf.mxu1 }
 0x1d9   :  { %v245_v41 = vadd.f32 %v266_v39, %v244_v40 }
 0x1da   :  { %v370_v42 = vpop.f32.mrf.mxu1 }
 0x1db   :  { %248 = vst [vmem:[#allocation8] sm:$0xff] %v245_v41 }
 0x1dc   :  { %452 = shalt.err (!%p449_p5)
}
 0x1dd   :  { %258 = dma.vmem_to_hbm [thread:$0]  %s256_s12, 128, %s562_s5, [#allocation4]  }
 0x1de   :  { %465 = dma.done.wait [#allocation4], 128  }
 0x1df   :  { %466 = vsyncadd [#allocation4], 4294967168 }
 0x1e0   :  { %262 = vsyncpa [#allocation3], 1 }
 0x1e1   :  { %263 = vsyncpa [#allocation6], 1 }
 0x1e2   :  { %264 = vsyncpa [#allocation4], 1 }

</bundles_post_ra>
